<compile_context>
chip_gen: v7x
topology: tpu7x:2x2x1
jax: 0.10.0
libtpu: 0.0.40
codegen_flags: <defaults>
</compile_context>

<pallas_src>
import jax
import jax.numpy as jnp
from jax import lax
from jax.experimental import pallas as pl
from jax.experimental.pallas import tpu as pltpu

_LANE = 128
_SUBLANE = 8


def _round_up(x: int, m: int) -> int:
    return ((x + m - 1) // m) * m


def _make_kl_kernel(temperature: float, n_rows: int, tile_n: int):
    inv_T = 1.0 / float(temperature)

    def kl_kernel(teacher_ref, student_ref, partial_ref):
        i = pl.program_id(0)

        # Temperature applied as a multiply (VPU), not a divide (EUP).
        # ---- student log-sum-exp first: only per-row scalars stay live ----
        s = student_ref[...].astype(jnp.float32) * inv_T
        s_max = jnp.max(s, axis=-1, keepdims=True)
        s_lse = jnp.log(jnp.sum(jnp.exp(s - s_max), axis=-1, keepdims=True))

        # ---- teacher softmax numerator / normalizer ----
        t = teacher_ref[...].astype(jnp.float32) * inv_T
        t_max = jnp.max(t, axis=-1, keepdims=True)
        t_exp = jnp.exp(t - t_max)
        t_sum = jnp.sum(t_exp, axis=-1, keepdims=True)

        # sum_c p*(log p - log q)
        #   = sum_c t_exp*((t - s) + (s_max - t_max)) / t_sum + s_lse - log(t_sum)
        # p / log_p / log_q never materialized; one divide per ROW.
        diff = (t - s) + (s_max - t_max)
        # Zero target==0 terms (teacher -inf), matching torch.kl_div, and drop
        # any NaN coming from garbage rows of the (overhanging) boundary block.
        cross = jnp.where(t_exp > 0.0, t_exp * diff, 0.0)
        num = jnp.sum(cross, axis=-1, keepdims=True)
        row_kl = num / t_sum + s_lse - jnp.log(t_sum)            # [tile_n, 1]

        # Mask rows past the true N (last grid block may overhang the array).
        row_idx = i * tile_n + lax.broadcasted_iota(jnp.int32, row_kl.shape, 0)
        row_kl = jnp.where(row_idx < n_rows, row_kl, 0.0)

        # Lane-dense (1,1,128) unmasked store of the per-block partial sum.
        partial_ref[...] = jnp.full(partial_ref.shape, jnp.sum(row_kl),
                                    dtype=jnp.float32)

    return kl_kernel


def kl_divergence_pallas(teacher_logit, student_logit, temperature: float = 1.0,
                         tile_n: int | None = None):
    """teacher_logit, student_logit: [N, C] logits (class axis last). Scalar f32."""
    assert teacher_logit.shape == student_logit.shape
    assert teacher_logit.ndim == 2
    N, C = teacher_logit.shape
    numel = N * C
    T = float(temperature)

    in_item = jnp.dtype(teacher_logit.dtype).itemsize
    c_lanes = _round_up(C, _LANE)  # VMEM lane footprint (layout only, no data pad)

    if tile_n is None:
        # Per-row VMEM footprint: 2 inputs x 2 pipeline buffers (native dtype)
        # + ~6 live f32 temporaries, all lane-padded to 128 in VMEM.
        bytes_per_row = (2 * 2 * in_item + 6 * 4) * c_lanes
        budget = 32 * 1024 * 1024
        tile_n = max(_SUBLANE, budget // bytes_per_row)
    # TODO(synk): for vocab-sized C (>~128k) where even tile_n=8 overflows v7x
    # VMEM, add a class-axis grid dim with online max/sum-exp accumulators.

    if N <= _SUBLANE:
        tile_n = N                                    # one block == whole array
    else:
        tile_n = max(_SUBLANE, (int(tile_n) // _SUBLANE) * _SUBLANE)
        tile_n = min(tile_n, _round_up(N, _SUBLANE))
        # >=2 "parallel" row blocks whenever possible (both v7x TCs stream HBM).
        half = _round_up((N + 1) // 2, _SUBLANE)
        if _SUBLANE <= half < N:
            tile_n = min(tile_n, half)

    num_blocks = -(-N // tile_n)

    kernel = _make_kl_kernel(T, N, tile_n)

    # Scoped-VMEM request: double-buffered inputs + f32 temporaries + outputs,
    # capped at 48 MiB so it fits v7x's 64 MiB physical VMEM with headroom.
    est_vmem = (2 * 2 * in_item + 6 * 4) * c_lanes * tile_n + 4 * _LANE * 4
    vmem_limit = int(min(48 * 1024 * 1024,
                         max(32 * 1024 * 1024, est_vmem + 4 * 1024 * 1024)))

    partials = pl.pallas_call(
        kernel,
        out_shape=jax.ShapeDtypeStruct((num_blocks, 1, _LANE), jnp.float32),
        grid_spec=pltpu.PrefetchScalarGridSpec(
            num_scalar_prefetch=0,
            grid=(num_blocks,),
            in_specs=[
                pl.BlockSpec((tile_n, C), lambda i: (i, 0)),
                pl.BlockSpec((tile_n, C), lambda i: (i, 0)),
            ],
            out_specs=pl.BlockSpec((1, 1, _LANE), lambda i: (i, 0, 0)),
        ),
        compiler_params=pltpu.CompilerParams(
            dimension_semantics=("parallel",),
            vmem_limit_bytes=vmem_limit,
        ),
    )(teacher_logit, student_logit)

    # Tiny final reduction in the wrapper (independent blocks -> both TCs usable).
    loss = jnp.sum(partials[:, 0, 0]) * (T * T / float(numel))
    return loss


def kl_divergence_ref(teacher_logit, student_logit, temperature: float = 1.0):
    """Plain-JAX reference matching PyTorch nn.KLDivLoss() (reduction='mean')."""
    T = temperature
    t = teacher_logit.astype(jnp.float32) / T
    s = student_logit.astype(jnp.float32) / T
    p = jax.nn.softmax(t, axis=1)
    log_p = jax.nn.log_softmax(t, axis=1)
    log_q = jax.nn.log_softmax(s, axis=1)
    return jnp.mean(p * (log_p - log_q)) * T * T


if __name__ == "__main__":
    key = jax.random.PRNGKey(0)
    k1, k2, k3, k4, k5, k6 = jax.random.split(key, 6)

    # Small demo shape consistent with the module: batch=8, num_classes=32.
    N, C = 8, 32
    temperature = 2.0
    teacher = jax.random.normal(k1, (N, C), dtype=jnp.float32)
    student = jax.random.normal(k2, (N, C), dtype=jnp.float32)
    loss = jax.block_until_ready(kl_divergence_pallas(teacher, student, temperature))
    ref = jax.block_until_ready(kl_divergence_ref(teacher, student, temperature))
    assert jnp.allclose(loss, ref, rtol=2e-5, atol=1e-6), (loss, ref)

    # Boundary-block path: N, C not multiples of (8, 128); no padding anywhere.
    N2, C2 = 13, 200
    teacher2 = jax.random.normal(k3, (N2, C2), dtype=jnp.float32)
    student2 = jax.random.normal(k4, (N2, C2), dtype=jnp.float32)
    loss2 = jax.block_until_ready(kl_divergence_pallas(teacher2, student2, 3.0))
    ref2 = jax.block_until_ready(kl_divergence_ref(teacher2, student2, 3.0))
    assert jnp.allclose(loss2, ref2, rtol=2e-5, atol=1e-6), (loss2, ref2)

    # Native-dtype (bf16) inputs + >=2 parallel row blocks.
    N3, C3 = 16, 256
    teacher3 = jax.random.normal(k5, (N3, C3), dtype=jnp.bfloat16)
    student3 = jax.random.normal(k6, (N3, C3), dtype=jnp.bfloat16)
    loss3 = jax.block_until_ready(kl_divergence_pallas(teacher3, student3, 1.5))
    ref3 = jax.block_until_ready(kl_divergence_ref(teacher3, student3, 1.5))
    assert jnp.allclose(loss3, ref3, rtol=2e-5, atol=1e-6), (loss3, ref3)

    print("KERNEL_OK")
</pallas_src>

<mosaic_0001>
module attributes {stable_mosaic.version = 11 : i64} {
  func.func @kl_kernel(%arg0: i32, %arg1: memref<8x32xf32, #tpu.memory_space<vmem>>, %arg2: memref<8x32xf32, #tpu.memory_space<vmem>>, %arg3: memref<1x1x128xf32, #tpu.memory_space<vmem>>) attributes {dimension_semantics = [#tpu.dimension_semantics<parallel>], iteration_bounds = array<i64: 1>, scalar_prefetch = 0 : i64, scratch_operands = 0 : i64, tpu.core_type = #tpu.core_type<tc>, window_params = [{transform_indices = @transform_0, window_bounds = array<i64: 8, 32>}, {transform_indices = @transform_1, window_bounds = array<i64: 8, 32>}, {transform_indices = @transform_2, window_bounds = array<i64: 1, 1, 128>}]} {
    %c0 = arith.constant 0 : index
    %c0_0 = arith.constant 0 : index
    %0 = vector.load %arg2[%c0, %c0_0] : memref<8x32xf32, #tpu.memory_space<vmem>>, vector<8x32xf32>
    %cst = arith.constant 5.000000e-01 : f32
    %1 = vector.broadcast %cst : f32 to vector<8x32xf32>
    %2 = arith.mulf %0, %1 : vector<8x32xf32>
    %cst_1 = arith.constant dense<0xFF800000> : vector<8xf32>
    %3 = vector.multi_reduction <maximumf>, %2, %cst_1 [1] : vector<8x32xf32> to vector<8xf32>
    %4 = vector.shape_cast %3 : vector<8xf32> to vector<8x1xf32>
    %5 = vector.broadcast %4 : vector<8x1xf32> to vector<8x32xf32>
    %6 = arith.subf %2, %5 : vector<8x32xf32>
    %7 = math.exp %6 : vector<8x32xf32>
    %cst_2 = arith.constant dense<0.000000e+00> : vector<8xf32>
    %8 = vector.multi_reduction <add>, %7, %cst_2 [1] : vector<8x32xf32> to vector<8xf32>
    %9 = vector.shape_cast %8 : vector<8xf32> to vector<8x1xf32>
    %10 = math.log %9 : vector<8x1xf32>
    %c0_3 = arith.constant 0 : index
    %c0_4 = arith.constant 0 : index
    %11 = vector.load %arg1[%c0_3, %c0_4] : memref<8x32xf32, #tpu.memory_space<vmem>>, vector<8x32xf32>
    %cst_5 = arith.constant 5.000000e-01 : f32
    %12 = vector.broadcast %cst_5 : f32 to vector<8x32xf32>
    %13 = arith.mulf %11, %12 : vector<8x32xf32>
    %cst_6 = arith.constant dense<0xFF800000> : vector<8xf32>
    %14 = vector.multi_reduction <maximumf>, %13, %cst_6 [1] : vector<8x32xf32> to vector<8xf32>
    %15 = vector.shape_cast %14 : vector<8xf32> to vector<8x1xf32>
    %16 = vector.broadcast %15 : vector<8x1xf32> to vector<8x32xf32>
    %17 = arith.subf %13, %16 : vector<8x32xf32>
    %18 = math.exp %17 : vector<8x32xf32>
    %cst_7 = arith.constant dense<0.000000e+00> : vector<8xf32>
    %19 = vector.multi_reduction <add>, %18, %cst_7 [1] : vector<8x32xf32> to vector<8xf32>
    %20 = vector.shape_cast %19 : vector<8xf32> to vector<8x1xf32>
    %21 = arith.subf %13, %2 : vector<8x32xf32>
    %22 = arith.subf %4, %15 : vector<8x1xf32>
    %23 = vector.broadcast %22 : vector<8x1xf32> to vector<8x32xf32>
    %24 = arith.addf %21, %23 : vector<8x32xf32>
    %cst_8 = arith.constant 0.000000e+00 : f32
    %25 = vector.broadcast %cst_8 : f32 to vector<8x32xf32>
    %26 = arith.cmpf ogt, %18, %25 : vector<8x32xf32>
    %27 = arith.mulf %18, %24 : vector<8x32xf32>
    %cst_9 = arith.constant 0.000000e+00 : f32
    %28 = vector.broadcast %cst_9 : f32 to vector<8x32xf32>
    %29 = arith.select %26, %27, %28 : vector<8x32xi1>, vector<8x32xf32>
    %cst_10 = arith.constant dense<0.000000e+00> : vector<8xf32>
    %30 = vector.multi_reduction <add>, %29, %cst_10 [1] : vector<8x32xf32> to vector<8xf32>
    %31 = vector.shape_cast %30 : vector<8xf32> to vector<8x1xf32>
    %32 = arith.divf %31, %20 : vector<8x1xf32>
    %33 = arith.addf %32, %10 : vector<8x1xf32>
    %34 = math.log %20 : vector<8x1xf32>
    %35 = arith.subf %33, %34 : vector<8x1xf32>
    %c8_i32 = arith.constant 8 : i32
    %36 = arith.muli %arg0, %c8_i32 : i32
    %37 = tpu.iota {dimensions = array<i32: 0>} : vector<8x1xi32>
    %38 = vector.broadcast %36 : i32 to vector<8x1xi32>
    %39 = arith.addi %38, %37 : vector<8x1xi32>
    %c8_i32_11 = arith.constant 8 : i32
    %40 = vector.broadcast %c8_i32_11 : i32 to vector<8x1xi32>
    %41 = arith.cmpi slt, %39, %40 : vector<8x1xi32>
    %cst_12 = arith.constant 0.000000e+00 : f32
    %42 = vector.broadcast %cst_12 : f32 to vector<8x1xf32>
    %43 = arith.select %41, %35, %42 : vector<8x1xi1>, vector<8x1xf32>
    %44 = vector.shape_cast %43 : vector<8x1xf32> to vector<1x8x1xf32>
    %cst_13 = arith.constant dense<0.000000e+00> : vector<1xf32>
    %45 = vector.multi_reduction <add>, %44, %cst_13 [1, 2] : vector<1x8x1xf32> to vector<1xf32>
    %46 = vector.shape_cast %45 : vector<1xf32> to vector<1x1x1xf32>
    %47 = vector.extract %46[0, 0, 0] : f32 from vector<1x1x1xf32>
    %48 = vector.broadcast %47 : f32 to vector<1x1x128xf32>
    %c0_14 = arith.constant 0 : index
    %c0_15 = arith.constant 0 : index
    %c0_16 = arith.constant 0 : index
    %49 = vector.load %arg3[%c0_14, %c0_15, %c0_16] : memref<1x1x128xf32, #tpu.memory_space<vmem>>, vector<1x1x128xf32>
    tpu.vector_store %arg3[%c0_14, %c0_15, %c0_16], %48 {strides = array<i32>} : memref<1x1x128xf32, #tpu.memory_space<vmem>>, vector<1x1x128xf32>,
    return
  }
  func.func @transform_0(%arg0: i32) -> (i32, i32) {
    %c0_i32 = arith.constant 0 : i32
    %c0_i32_0 = arith.constant 0 : i32
    return %arg0, %c0_i32 : i32, i32
  }
  func.func @transform_1(%arg0: i32) -> (i32, i32) {
    %c0_i32 = arith.constant 0 : i32
    %c0_i32_0 = arith.constant 0 : i32
    return %arg0, %c0_i32 : i32, i32
  }
  func.func @transform_2(%arg0: i32) -> (i32, i32, i32) {
    %c0_i32 = arith.constant 0 : i32
    %c0_i32_0 = arith.constant 0 : i32
    %c0_i32_1 = arith.constant 0 : i32
    return %arg0, %c0_i32, %c0_i32_0 : i32, i32, i32
  }
}

</mosaic_0001>

<bundles_post_ra>
// kernel: tpu_custom_call.1
= control target key start
LH: loop header
LB: loop body
LE: loop exit
PB: predicated region body
PF: predicated region fallthrough
CT: control target
= control target key end

     0   :  { %7 = vsyncpa [#allocation3], 0  ;;  %s258_s0 = inlined_call_operand.hbm [shape: f32[8,32], index: 0, kind: input, shape index: {}]   ;;  %s259_s1 = inlined_call_operand.hbm [shape: f32[8,32], index: 1, kind: input, shape index: {}]   ;;  %s260_s2 = inlined_call_operand.hbm [shape: f32[1,1,128], index: 2, kind: output, shape index: {}]  }
   0x1   :  { %8 = vsyncpa [#allocation6], 0 }
   0x2   :  { %9 = vsyncpa [#allocation4], 0  ;;  %s199_s9 = smov [#allocation2]   ;;  %s200_s11 = smov [#allocation5]  }
   0x3   :  { %s16_s10 = sshll.u32 %s199_s9, 4  ;;  %s26_s12 = sshll.u32 %s200_s11, 4  ;;  %s17_s10 = int_to_ptr.vmem [resolvable:$true] %s16_s10  ;;  %s27_s12 = int_to_ptr.vmem [resolvable:$true] %s26_s12 }
   0x4   :  { %s127_s15 = scalar_lea.hbm %s258_s0, 128 }
   0x5   :  { %p128_p0 = scmp.ne.s32.totalorder %s258_s0, %s127_s15  ;;  %p131_p1 = scmp.lt.u32.totalorder %s127_s15, %s258_s0 }
   0x7   :  { %p133_p2 = pnand %p131_p1, %p128_p0 }
   0x9   :  { %136 = shalt.err (!%p133_p2)
}
   0xa   :  { %s137_s20 = scalar_lea.vmem %s17_s10, 128  ;;  %p142_p4 = scmp.lt.s32.totalorder %s17_s10, %s17_s10 }
   0xb   :  { %p138_p3 = scmp.ne.s32.totalorder %s17_s10, %s137_s20  ;;  %p143_p5 = scmp.lt.s32.totalorder %s137_s20, %s137_s20 }
   0xd   :  { %p144_p6 = por %p143_p5, %p142_p4 }
   0xf   :  { %p145_p7 = pnand %p144_p6, %p138_p3 }
  0x11   :  { %148 = shalt.err (!%p145_p7)
}
  0x12   :  { %19 = dma.hbm_to_vmem [thread:$0]  %s258_s0, 128, %s17_s10, [#allocation3]  }
  0x13   :  { %s149_s25 = scalar_lea.hbm %s259_s1, 128 }
  0x14   :  { %p150_p8 = scmp.ne.s32.totalorder %s259_s1, %s149_s25  ;;  %p153_p9 = scmp.lt.u32.totalorder %s149_s25, %s259_s1 }
  0x16   :  { %p155_p10 = pnand %p153_p9, %p150_p8 }
  0x18   :  { %158 = shalt.err (!%p155_p10)
}
  0x19   :  { %s159_s30 = scalar_lea.vmem %s27_s12, 128  ;;  %p164_p12 = scmp.lt.s32.totalorder %s27_s12, %s27_s12 }
  0x1a   :  { %p160_p11 = scmp.ne.s32.totalorder %s27_s12, %s159_s30  ;;  %p165_p13 = scmp.lt.s32.totalorder %s159_s30, %s159_s30 }
  0x1c   :  { %p166_p0 = por %p165_p13, %p164_p12 }
  0x1e   :  { %p167_p1 = pnand %p166_p0, %p160_p11 }
  0x20   :  { %170 = shalt.err (!%p167_p1)
}
  0x21   :  { %29 = dma.hbm_to_vmem [thread:$0]  %s259_s1, 128, %s27_s12, [#allocation6]  }
  0x22   :  { %193 = dma.done.wait [#allocation3], 128  }
  0x23   :  { %194 = vsyncadd [#allocation3], 4294967168 }
  0x24   :  { %195 = dma.done.wait [#allocation6], 128  }
  0x25   :  { %196 = vsyncadd [#allocation6], 4294967168  ;;  %v36_v0 = vld [vmem:[#allocation5] sm:$0xff]  ;;  %vm38_vm0 = vcmask 261120   ;;  %v50_v1 = vld [vmem:[#allocation2] sm:$0xff]  ;;  %vm83_vm2 = vcmask 7168  }
  0x26   :  { %v37_v2 = vmul.f32 0.5, %v36_v0  ;;  %v51_v3 = vmul.f32 0.5, %v50_v1  ;;  %s201_s1 = smov [#allocation7]  }
  0x27   :  { %s102_s4 = sshll.u32 %s201_s1, 4  ;;  %s103_s4 = int_to_ptr.vmem [resolvable:$true] %s102_s4 }
  0x28   :  { %v39_v4 = vsel %vm38_vm0, %v37_v2, -inf  ;;  %v52_v5 = vsel %vm38_vm0, %v51_v3, -inf  ;;  %v61_v12 = vsub.f32 %v51_v3, %v37_v2  ;;  %s171_s6 = scalar_lea.vmem %s103_s4, 16  ;;  %s175_s7 = scalar_lea.vmem %s103_s4, 32 }
  0x29   :  { %40 = vmax.xlane.f32.xlu0 %v39_v4  ;;  %p172_p2 = scmp.ne.s32.totalorder %s103_s4, %s171_s6  ;;  %p176_p3 = scmp.lt.s32.totalorder %s103_s4, %s103_s4 }
  0x2a   :  { %p177_p4 = scmp.lt.s32.totalorder %s175_s7, %s171_s6 }
  0x2c   :  { %p178_p5 = por %p177_p4, %p176_p3 }
  0x2d   :  { %53 = vmax.xlane.f32.xlu0 %v52_v5 }
  0x2e   :  { %p179_p6 = pnand %p178_p5, %p172_p2 }
  0xb6   :  { %v41_v6 = vpop.xlane.xlu0 %40 }
  0xb7   :  { %v42_v7 = vsub.f32 %v37_v2, %v41_v6 }
  0xb9   :  { %v43_v8 = vmul.f32 1.442695, %v42_v7 }
  0xba   :  { %v54_v9 = vpop.xlane.xlu0 %53 }
  0xbb   :  { %117 = vpow2.f32 %v43_v8  ;;  %v55_v10 = vsub.f32 %v51_v3, %v54_v9  ;;  %v62_v13 = vsub.f32 %v41_v6, %v54_v9 }
  0xbd   :  { %v56_v11 = vmul.f32 1.442695, %v55_v10  ;;  %v63_v16 = vadd.f32 %v62_v13, %v61_v12 }
  0xbf   :  { %119 = vpow2.f32 %v56_v11 }
  0xc5   :  { %v118_v14 = vpop.eup %117 }
  0xc6   :  { %v45_v15 = vsel %vm38_vm0, %v118_v14, 0.0 }
  0xc7   :  { %46 = vadd.xlane.f32.xlu1 %v45_v15 }
  0xc9   :  { %v120_v17 = vpop.eup %119 }
  0xca   :  { %v58_v18 = vsel %vm38_vm0, %v120_v17, 0.0  ;;  %vm64_vm1 = vcmp.gt.f32.partialorder %v120_v17, 0.0  ;;  %v65_v19 = vmul.f32 %v120_v17, %v63_v16 }
  0xcb   :  { %59 = vadd.xlane.f32.xlu1 %v58_v18 }
  0xcc   :  { %v66_v20 = vsel %vm64_vm1, %v65_v19, 0.0 }
  0xcd   :  { %v67_v21 = vsel %vm38_vm0, %v66_v20, 0.0 }
  0xce   :  { %68 = vadd.xlane.f32.xlu0 %v67_v21 }
 0x154   :  { %v47_v22 = vpop.xlane.xlu1 %46 }
 0x155   :  { %121 = vlog2.f32 %v47_v22 }
 0x158   :  { %v60_v23 = vpop.xlane.xlu1 %59 }
 0x159   :  { %123 = vrcp.f32 %v60_v23 }
 0x15a   :  { %125 = vlog2.f32 %v60_v23 }
 0x15b   :  { %v69_v26 = vpop.xlane.xlu0 %68 }
 0x15f   :  { %v122_v24 = vpop.eup %121 }
 0x160   :  { %v49_v28 = vmul.f32 0.6931472, %v122_v24 }
 0x163   :  { %v124_v25 = vpop.eup %123 }
 0x164   :  { %v126_v27 = vpop.eup %125  ;;  %v71_v29 = vmul.f32 %v124_v25, %v69_v26 }
 0x165   :  { %v74_v31 = vmul.f32 0.6931472, %v126_v27 }
 0x166   :  { %v72_v30 = vadd.f32 %v71_v29, %v49_v28 }
 0x168   :  { %v75_v32 = vsub.f32 %v72_v30, %v74_v31 }
 0x16a   :  { %v84_v33 = vsel %vm83_vm2, %v75_v32, 0.0 }
 0x16b   :  { %85 = vadd.xlane.f32.xlu1 %v84_v33 }
 0x1f8   :  { %v86_v34 = vpop.xlane.xlu1 %85 }
 0x1f9   :  { %v87_v35 = vrot.slane %v86_v34, 4 }
 0x1fb   :  { %v88_v36 = vadd.f32 %v87_v35, %v86_v34 }
 0x1fd   :  { %v89_v37 = vrot.slane %v88_v36, 2 }
 0x1ff   :  { %v90_v38 = vadd.f32 %v89_v37, %v88_v36 }
 0x201   :  { %v91_v39 = vrot.slane %v90_v38, 1 }
 0x203   :  { %v92_v40 = vadd.f32 %v91_v39, %v90_v38 }
 0x205   :  { %112 = vpush %v92_v40 }
 0x236   :  { %s113_s5 = spop %112 }
 0x237   :  { %v94_v41 = vstv %s113_s5 }
 0x238   :  { %95 = vst [vmem:[#allocation7] sm:$0x1] %v94_v41 }
 0x239   :  { %182 = shalt.err (!%p179_p6)
}
 0x23a   :  { %s183_s10 = scalar_lea.hbm %s260_s2, 16 }
 0x23b   :  { %p184_p7 = scmp.ne.s32.totalorder %s260_s2, %s183_s10  ;;  %p187_p8 = scmp.lt.u32.totalorder %s183_s10, %s260_s2 }
 0x23d   :  { %p189_p9 = pnand %p187_p8, %p184_p7 }
 0x23f   :  { %192 = shalt.err (!%p189_p9)
}
 0x240   :  { %105 = dma.vmem_to_hbm [thread:$0]  %s103_s4, 16, %s260_s2, [#allocation4]  }
 0x241   :  { %197 = dma.done.wait [#allocation4], 16  }
 0x242   :  { %198 = vsyncadd [#allocation4], 4294967280 }
 0x243   :  { %109 = vsyncpa [#allocation3], 1 }
 0x244   :  { %110 = vsyncpa [#allocation6], 1 }
 0x245   :  { %111 = vsyncpa [#allocation4], 1 }

</bundles_post_ra>
